<compile_context>
chip_gen: v6e
topology: v6e:2x2x1
jax: 0.10.0
libtpu: 0.0.40
codegen_flags: <defaults>
</compile_context>

<pallas_src>
import jax
import jax.numpy as jnp
from jax import lax
from jax.experimental import pallas as pl
from jax.experimental.pallas import tpu as pltpu

EPS = 1e-5  # nn.InstanceNorm2d default eps


def downsampling_block_kernel(
    patches_ref,   # (1, K, P)  im2col patches, K = Cin*9, P = Ho*Wo (lane dim)
    wconv_ref,     # (C, K)     conv weight reshaped to (Cout, Cin*3*3)
    scale_ref,     # (1, C, 1)  AdaIN scale for this batch element
    shift_ref,     # (1, C, 1)  AdaIN shift for this batch element
    out_ref,       # (1, C, P)  NCHW-native output block (lane-dense in P)
):
    patches = patches_ref[0]                                        # (K, P)

    # Conv2d(3x3, stride=2, padding=1) as (C,K)@(K,P) -> channel-major (C,P).
    # Conv bias intentionally omitted: it is cancelled by the InstanceNorm
    # mean subtraction below, so it is dead compute.
    conv = jnp.dot(wconv_ref[...], patches,
                   preferred_element_type=jnp.float32)              # (C, P)

    # InstanceNorm2d stats per channel over the spatial (lane) axis, one pass.
    mean = jnp.mean(conv, axis=1, keepdims=True)                    # (C, 1)
    var = jnp.mean(conv * conv, axis=1, keepdims=True) - mean * mean

    # Fused norm + AdaIN affine + ReLU:  y = relu(conv * a + b).
    a = scale_ref[0] * lax.rsqrt(var + EPS)                         # (C, 1)
    b = shift_ref[0] - mean * a                                     # (C, 1)
    out_ref[0] = jnp.maximum(conv * a + b, 0.0)


def downsampling_block(x_nchw, style, inoise, params):
    # `inoise` / `to_noise` exist in the PyTorch module but are never used in
    # forward(), so they are accepted and ignored for parity.
    del inoise
    B, Cin, H, W = x_nchw.shape
    Ho = (H + 2 - 3) // 2 + 1
    Wo = (W + 2 - 3) // 2 + 1
    P = Ho * Wo
    C = params["conv_w"].shape[0]
    K = Cin * 9

    # --- im2col directly in (B, K, P) channel/tap-major, spatial-minor layout.
    # No NCHW->NHWC transpose needed, and the kernel output is already NCHW.
    x_pad = jnp.pad(x_nchw, ((0, 0), (0, 0), (1, 1), (1, 1)))
    taps = [x_pad[:, :, ky:ky + 2 * Ho:2, kx:kx + 2 * Wo:2]
            for ky in range(3) for kx in range(3)]                  # (B,Cin,Ho,Wo) each
    patches = jnp.stack(taps, axis=2).reshape(B, K, P)              # (B, Cin*9, P)
    # TODO(synk): `patches` still materializes ~9x the input bytes in HBM; for
    # large images fuse the im2col into the kernel with manual strided DMAs.

    # Conv weight (Cout, Cin, 3, 3) -> (C, Cin*9), matching the K ordering above.
    wconv = params["conv_w"].reshape(C, K)

    # Style path hoisted out of the kernel (three M=1 matmuls are MXU-hostile).
    s2 = style @ params["w2"] + params["b2"]                        # (B, S)
    scale = (s2 @ params["ws"] + params["bs"]).reshape(B, C, 1)
    shift = (s2 @ params["wsh"] + params["bsh"]).reshape(B, C, 1)

    out = pl.pallas_call(
        downsampling_block_kernel,
        out_shape=jax.ShapeDtypeStruct((B, C, P), jnp.float32),
        grid_spec=pltpu.PrefetchScalarGridSpec(
            num_scalar_prefetch=0,
            grid=(B,),
            in_specs=[
                pl.BlockSpec((1, K, P), lambda b: (b, 0, 0)),
                pl.BlockSpec((C, K), lambda b: (0, 0)),
                pl.BlockSpec((1, C, 1), lambda b: (b, 0, 0)),
                pl.BlockSpec((1, C, 1), lambda b: (b, 0, 0)),
            ],
            out_specs=pl.BlockSpec((1, C, P), lambda b: (b, 0, 0)),
        ),
        compiler_params=pltpu.CompilerParams(
            dimension_semantics=("parallel",)),   # batch steps are independent
    )(patches, wconv, scale, shift)

    # (B, C, P) -> (B, C, Ho, Wo): pure reshape, no transpose/extra HBM pass.
    return out.reshape(B, C, Ho, Wo)


def reference_downsampling_block(x_nchw, style, params):
    """Pure-JAX reference mirroring the PyTorch forward pass."""
    conv = lax.conv_general_dilated(
        x_nchw, params["conv_w"], window_strides=(2, 2),
        padding=((1, 1), (1, 1)),
        dimension_numbers=("NCHW", "OIHW", "NCHW"))
    conv = conv + params["conv_b"][None, :, None, None]
    mean = jnp.mean(conv, axis=(2, 3), keepdims=True)
    var = jnp.mean((conv - mean) ** 2, axis=(2, 3), keepdims=True)
    normalized = (conv - mean) / jnp.sqrt(var + EPS)
    s2 = style @ params["w2"] + params["b2"]
    scale = (s2 @ params["ws"] + params["bs"])[:, :, None, None]
    shift = (s2 @ params["wsh"] + params["bsh"])[:, :, None, None]
    return jnp.maximum(scale * normalized + shift, 0.0)


def init_params(key, in_features, out_features, style_dim):
    ks = jax.random.split(key, 8)
    scale = 0.1
    return {
        "conv_w": scale * jax.random.normal(ks[0], (out_features, in_features, 3, 3), jnp.float32),
        "conv_b": scale * jax.random.normal(ks[1], (out_features,), jnp.float32),
        "w2":     scale * jax.random.normal(ks[2], (style_dim, style_dim), jnp.float32),
        "b2":     scale * jax.random.normal(ks[3], (style_dim,), jnp.float32),
        "ws":     scale * jax.random.normal(ks[4], (style_dim, out_features), jnp.float32),
        "bs":     scale * jax.random.normal(ks[5], (out_features,), jnp.float32),
        "wsh":    scale * jax.random.normal(ks[6], (style_dim, out_features), jnp.float32),
        "bsh":    scale * jax.random.normal(ks[7], (out_features,), jnp.float32),
        # TODO(synk): to_noise = nn.Linear(1, out_features) exists in __init__
        # but is never used in forward(), so it is intentionally not created.
    }


if __name__ == "__main__":
    B, Cin, Cout, H, W, S = 2, 4, 8, 16, 16, 16
    key = jax.random.PRNGKey(0)
    kx, ks_, kn, kp = jax.random.split(key, 4)

    x = jax.random.normal(kx, (B, Cin, H, W), jnp.float32)
    style = jax.random.normal(ks_, (B, S), jnp.float32)
    inoise = jax.random.normal(kn, (B, H // 2, W // 2, 1), jnp.float32)  # unused, like PyTorch
    params = init_params(kp, Cin, Cout, S)

    out = downsampling_block(x, style, inoise, params)
    out = jax.block_until_ready(out)

    ref = reference_downsampling_block(x, style, params)
    assert out.shape == (B, Cout, H // 2, W // 2), out.shape
    assert jnp.allclose(out, ref, atol=1e-3, rtol=1e-3), float(jnp.max(jnp.abs(out - ref)))

    print("KERNEL_OK")
</pallas_src>

<mosaic_0001>
module attributes {stable_mosaic.version = 11 : i64} {
  func.func @downsampling_block_kernel(%arg0: i32, %arg1: memref<1x36x64xf32, #tpu.memory_space<vmem>>, %arg2: memref<8x36xf32, #tpu.memory_space<vmem>>, %arg3: memref<1x8x1xf32, #tpu.memory_space<vmem>>, %arg4: memref<1x8x1xf32, #tpu.memory_space<vmem>>, %arg5: memref<1x8x64xf32, #tpu.memory_space<vmem>>) attributes {dimension_semantics = [#tpu.dimension_semantics<parallel>], iteration_bounds = array<i64: 2>, scalar_prefetch = 0 : i64, scratch_operands = 0 : i64, tpu.core_type = #tpu.core_type<tc>, window_params = [{transform_indices = @transform_0, window_bounds = array<i64: 1, 36, 64>}, {pipeline_mode = #tpu.pipeline_mode<synchronous>, transform_indices = @transform_1, window_bounds = array<i64: 8, 36>}, {transform_indices = @transform_2, window_bounds = array<i64: 1, 8, 1>}, {transform_indices = @transform_3, window_bounds = array<i64: 1, 8, 1>}, {transform_indices = @transform_4, window_bounds = array<i64: 1, 8, 64>}]} {
    %c0 = arith.constant 0 : index
    %c0_0 = arith.constant 0 : index
    %c0_1 = arith.constant 0 : index
    %0 = vector.load %arg1[%c0, %c0_0, %c0_1] : memref<1x36x64xf32, #tpu.memory_space<vmem>>, vector<1x36x64xf32>
    %1 = vector.shape_cast %0 : vector<1x36x64xf32> to vector<36x64xf32>
    %c0_2 = arith.constant 0 : index
    %c0_3 = arith.constant 0 : index
    %2 = vector.load %arg2[%c0_2, %c0_3] : memref<8x36xf32, #tpu.memory_space<vmem>>, vector<8x36xf32>
    %cst = arith.constant dense<0.000000e+00> : vector<8x64xf32>
    %3 = tpu.matmul %2, %1, %cst {dimension_numbers = #tpu.dot_dimension_numbers<[1], [0], [0], [1], [0, 0, 1, 1], [], []>} : vector<8x36xf32>, vector<36x64xf32>, vector<8x64xf32> -> vector<8x64xf32>
    %cst_4 = arith.constant dense<0.000000e+00> : vector<8xf32>
    %4 = vector.multi_reduction <add>, %3, %cst_4 [1] : vector<8x64xf32> to vector<8xf32>
    %5 = vector.shape_cast %4 : vector<8xf32> to vector<8x1xf32>
    %cst_5 = arith.constant 6.400000e+01 : f32
    %6 = vector.broadcast %cst_5 : f32 to vector<8x1xf32>
    %7 = arith.divf %5, %6 : vector<8x1xf32>
    %8 = arith.mulf %3, %3 : vector<8x64xf32>
    %cst_6 = arith.constant dense<0.000000e+00> : vector<8xf32>
    %9 = vector.multi_reduction <add>, %8, %cst_6 [1] : vector<8x64xf32> to vector<8xf32>
    %10 = vector.shape_cast %9 : vector<8xf32> to vector<8x1xf32>
    %cst_7 = arith.constant 6.400000e+01 : f32
    %11 = vector.broadcast %cst_7 : f32 to vector<8x1xf32>
    %12 = arith.divf %10, %11 : vector<8x1xf32>
    %13 = arith.mulf %7, %7 : vector<8x1xf32>
    %14 = arith.subf %12, %13 : vector<8x1xf32>
    %c0_8 = arith.constant 0 : index
    %c0_9 = arith.constant 0 : index
    %c0_10 = arith.constant 0 : index
    %15 = vector.load %arg3[%c0_8, %c0_9, %c0_10] : memref<1x8x1xf32, #tpu.memory_space<vmem>>, vector<1x8x1xf32>
    %16 = vector.shape_cast %15 : vector<1x8x1xf32> to vector<8x1xf32>
    %cst_11 = arith.constant 9.99999974E-6 : f32
    %17 = vector.broadcast %cst_11 : f32 to vector<8x1xf32>
    %18 = arith.addf %14, %17 : vector<8x1xf32>
    %19 = math.rsqrt %18 : vector<8x1xf32>
    %20 = arith.mulf %16, %19 : vector<8x1xf32>
    %c0_12 = arith.constant 0 : index
    %c0_13 = arith.constant 0 : index
    %c0_14 = arith.constant 0 : index
    %21 = vector.load %arg4[%c0_12, %c0_13, %c0_14] : memref<1x8x1xf32, #tpu.memory_space<vmem>>, vector<1x8x1xf32>
    %22 = vector.shape_cast %21 : vector<1x8x1xf32> to vector<8x1xf32>
    %23 = arith.mulf %7, %20 : vector<8x1xf32>
    %24 = arith.subf %22, %23 : vector<8x1xf32>
    %25 = vector.broadcast %20 : vector<8x1xf32> to vector<8x64xf32>
    %26 = arith.mulf %3, %25 : vector<8x64xf32>
    %27 = vector.broadcast %24 : vector<8x1xf32> to vector<8x64xf32>
    %28 = arith.addf %26, %27 : vector<8x64xf32>
    %cst_15 = arith.constant 0.000000e+00 : f32
    %29 = vector.broadcast %cst_15 : f32 to vector<8x64xf32>
    %30 = arith.maximumf %28, %29 : vector<8x64xf32>
    %c0_16 = arith.constant 0 : index
    %c0_17 = arith.constant 0 : index
    %c0_18 = arith.constant 0 : index
    %31 = vector.load %arg5[%c0_16, %c0_17, %c0_18] : memref<1x8x64xf32, #tpu.memory_space<vmem>>, vector<1x8x64xf32>
    %32 = vector.shape_cast %31 : vector<1x8x64xf32> to vector<8x64xf32>
    %33 = vector.shape_cast %30 : vector<8x64xf32> to vector<1x8x64xf32>
    tpu.vector_store %arg5[%c0_16, %c0_17, %c0_18], %33 {strides = array<i32>} : memref<1x8x64xf32, #tpu.memory_space<vmem>>, vector<1x8x64xf32>,
    return
  }
  func.func @transform_0(%arg0: i32) -> (i32, i32, i32) {
    %c0_i32 = arith.constant 0 : i32
    %c0_i32_0 = arith.constant 0 : i32
    %c0_i32_1 = arith.constant 0 : i32
    return %arg0, %c0_i32, %c0_i32_0 : i32, i32, i32
  }
  func.func @transform_1(%arg0: i32) -> (i32, i32) {
    %c0_i32 = arith.constant 0 : i32
    %c0_i32_0 = arith.constant 0 : i32
    %c0_i32_1 = arith.constant 0 : i32
    return %c0_i32, %c0_i32_0 : i32, i32
  }
  func.func @transform_2(%arg0: i32) -> (i32, i32, i32) {
    %c0_i32 = arith.constant 0 : i32
    %c0_i32_0 = arith.constant 0 : i32
    %c0_i32_1 = arith.constant 0 : i32
    return %arg0, %c0_i32, %c0_i32_0 : i32, i32, i32
  }
  func.func @transform_3(%arg0: i32) -> (i32, i32, i32) {
    %c0_i32 = arith.constant 0 : i32
    %c0_i32_0 = arith.constant 0 : i32
    %c0_i32_1 = arith.constant 0 : i32
    return %arg0, %c0_i32, %c0_i32_0 : i32, i32, i32
  }
  func.func @transform_4(%arg0: i32) -> (i32, i32, i32) {
    %c0_i32 = arith.constant 0 : i32
    %c0_i32_0 = arith.constant 0 : i32
    %c0_i32_1 = arith.constant 0 : i32
    return %arg0, %c0_i32, %c0_i32_0 : i32, i32, i32
  }
}

</mosaic_0001>

<bundles_post_ra>
// kernel: tpu_custom_call.1
= control target key start
LH: loop header
LB: loop body
LE: loop exit
PB: predicated region body
PF: predicated region fallthrough
CT: control target
= control target key end

     0   :  { %9 = vsyncpa [#allocation3], 0  ;;  %s719_s0 = inlined_call_operand.vmem [shape: f32[2,36,64], index: 0, kind: input, shape index: {}]   ;;  %s720_s1 = inlined_call_operand.vmem [shape: f32[8,36], index: 1, kind: input, shape index: {}]   ;;  %s721_s2 = inlined_call_operand.vmem [shape: f32[2,8,1], index: 2, kind: input, shape index: {}]   ;;  %s722_s3 = inlined_call_operand.vmem [shape: f32[2,8,1], index: 3, kind: input, shape index: {}]   ;;  %s723_s4 = inlined_call_operand.hbm [shape: f32[2,8,64], index: 4, kind: output, shape index: {}]  }
   0x1   :  { %11 = vsyncpa [#allocation3 + $0x1], 0  ;;  %s616_s15 = smov 0   ;;  %s618_s16 = smov 0  }
   0x2   :  { %s620_s17 = smov 0   ;;  %s622_s18 = smov 0  }
   0x3 LB: > { %s637_s19 = sadd.s32 4294967295, %s585_s18   ;;  %s445_s20 = sadd.s32 4294967294, %s585_s18   ;;  %s585_s18 = sphi %s622_s18, %s729_s18   ;;  %s581_s17 = sphi %s620_s17, %s728_s17   ;;  %s577_s16 = sphi %s618_s16, %s727_s16   ;;  %s573_s15 = sphi %s616_s15, %s726_s15  }
   0x4   : > { %s641_s21 = sadd.s32 1, %s585_s18   ;;  %s123_s22 = sadd.s32 1, %s581_s17 }
   0x5   : > { %s120_s23 = ssub.s32 %s585_s18, %s641_s21  ;;  %p133_p0 = scmp.ne.s32.totalorder %s581_s17, %s577_s16 }
   0x6   : > { %p121_p1 = scmp.eq.s32.totalorder %s120_s23, 0  ;;  %p134_p2 = scmp.eq.s32.totalorder %s637_s19, 1 }
   0x7   : > { %p139_p3 = scmp.ne.s32.totalorder %s577_s16, %s573_s15  ;;  %p140_p4 = scmp.eq.s32.totalorder %s445_s20, 1 }
   0x8   : > { %s652_s24 = scalar_select %p121_p1, %s581_s17, %s123_s22  }
   0x9   : > { %p654_p5 = por %p134_p2, %p133_p0  ;;  %p658_p6 = por %p140_p4, %p139_p3 }
   0xa   : > { %p448_p7 = scmp.ge.s32.totalorder %s585_s18, 1  ;;  %p183_p8 = scmp.lt.s32.totalorder %s585_s18, 3 }
   0xc   : > { %p184_p9 = pnand %p448_p7, %p183_p8 }
   0xd   : > { %p217_p10 = scmp.lt.s32.totalorder (!%p184_p9), %s637_s19, 1  ;;  %s214_s20 = sand.u32 (!%p184_p9), 1, %s577_s16  }
   0xe   : > { %187 = sbr.rel (%p184_p9) target bundleno = 537 (0x219), region = 36  ;;  %s449_s22 = sshll.u32 (!%p184_p9), %s214_s20, 3 }
   0xf   : > { %s456_s23 = sshll.u32 (!%p184_p9), %s637_s19, 7  ;;  %s349_s6 = scalar_lea.sflag (!%p184_p9), [#allocation3], %s214_s20 }
  0x13   : > { %v587_v0 = vmov 0.0   ;;  %vm588_vm0 = vmmov 0   ;;  %s666_s27 = scalar_select %p217_p10, %s637_s19, 1  ;;  %vm240_vm1 = vcmask 1043456   ;;  %v235_v6 = vld [vmem:[%s720_s1] sm:$0xff]  ;;  %vm236_vm2 = vcmask 293888  }
  0x14   : > { %465 = vmatprep.subr.mxu0 %v587_v0  ;;  %475 = vmatprep.mubr.msk.f32.mxu0 %vm588_vm0, %v587_v0  ;;  %vm314_vm3 = vcmask 523264   ;;  %v589_v12 = vmov 0  }
  0x15   : > { %s478_s28 = smul.u32 40, %s666_s27  ;;  %521 = vset.pattern.permute.xlu1 %v589_v12  ;;  %522 = vset.pattern.permute.xlu0 %v589_v12  ;;  %s451_s8 = sshll.u32 %s666_s27, 3 }
  0x16   : > { %s225_s11 = scalar_lea.vmem %s721_s2, %s451_s8  ;;  %s229_s14 = scalar_lea.vmem %s722_s3, %s451_s8 }
  0x17   : > { %s221_s5 = scalar_lea.vmem %s719_s0, %s478_s28  ;;  %v327_v20 = vld [vmem:[%s225_s11] sm:$0xff]  ;;  %s216_s27 = scalar_lea.vmem [#allocation2], %s449_s22 }
  0x18   : > { %v234_v1 = vld [vmem:[%s221_s5 + $0x20] sm:$0xf]  ;;  %v233_v2 = vld [vmem:[%s221_s5 + $0x18] sm:$0xff]  ;;  %v232_v3 = vld [vmem:[%s221_s5 + $0x10] sm:$0xff]  ;;  %s362_s28 = sshll.u32 %s216_s27, 4  ;;  %s590_s8 = smov [#allocation2]   ;;  %s363_s28 = int_to_ptr.vmem [resolvable:$true] %s362_s28 }
  0x19   : > { %466 = vmatpush3.msk.msra.mxu0 %vm240_vm1, %v234_v1  ;;  %v231_v4 = vld [vmem:[%s221_s5 + $0x8] sm:$0xff]  ;;  %v230_v5 = vld [vmem:[%s221_s5] sm:$0xff]  ;;  %s360_s5 = scalar_lea.hbm %s723_s4, %s456_s23  ;;  %s525_s7 = scalar_lea.vmem %s363_s28, 128 }
  0x1a   : > { %467 = vmatprep.subr.mxu0 %v587_v0  ;;  %v331_v23 = vld [vmem:[%s229_s14] sm:$0xff]  ;;  %p526_p11 = scmp.ne.s32.totalorder %s363_s28, %s525_s7  ;;  %s529_s9 = sshll.u32 %s590_s8, 4  ;;  %s530_s9 = int_to_ptr.vmem [resolvable:$false] %s529_s9 }
  0x1b   : > { %468 = vmatpush3.msra.mxu0 %v233_v2  ;;  %s531_s19 = scalar_lea.vmem %s530_s9, 256  ;;  %p532_p0 = scmp.lt.s32.totalorder %s363_s28, %s530_s9 }
  0x1c   : > { %469 = vmatprep.subr.mxu0 %v587_v0  ;;  %p527_p12 = pnand %p526_p11, %p654_p5  ;;  %p533_p1 = scmp.lt.s32.totalorder %s531_s19, %s525_s7 }
  0x1d   : > { %470 = vmatpush3.msra.mxu0 %v232_v3 }
  0x1e   : > { %471 = vmatprep.subr.mxu0 %v587_v0  ;;  %p528_p13 = pneg %p527_p12  ;;  %p534_p2 = por %p533_p1, %p532_p0 }
  0x1f   : > { %472 = vmatpush3.msra.mxu0 %v231_v4 }
  0x20   : > { %473 = vmatprep.subr.mxu0 %v587_v0  ;;  %p535_p3 = pnand %p534_p2, %p528_p13 }
  0x21   : > { %474 = vmatpush3.msra.mxu0 %v230_v5 }
  0x22   : > { %476 = vmatmul.mubr.msk.f32.vlgmr.msra.gmra.mxu0 %vm236_vm2, %v235_v6 }
  0xe2   : > { %v310_v7 = vpop.f32.mrf.mxu0 }
  0xe3   : > { %v315_v8 = vsel %vm314_vm3, %v310_v7, 0.0  ;;  %v320_v9 = vmul.f32 %v310_v7, %v310_v7 }
  0xe4   : > { %316 = vadd.xlane.f32.xlu0 %v315_v8  ;;  %v477_v10 = vpop.f32.mrf.mxu0 }
  0xe5   : > { %v321_v11 = vsel %vm314_vm3, %v320_v9, 0.0 }
  0xe8   : > { %322 = vadd.xlane.f32.xlu0 %v321_v11 }
 0x16d   : > { %v317_v13 = vpop.xlane.xlu0 %316 }
 0x16e   : > { %v319_v14 = vmul.f32 0.015625, %v317_v13 }
 0x170   : > { %v325_v16 = vmul.f32 %v319_v14, %v319_v14 }
 0x171   : > { %v323_v15 = vpop.xlane.xlu0 %322 }
 0x172   : > { %v324_v17 = vmul.f32 0.015625, %v323_v15 }
 0x174   : > { %v326_v18 = vsub.f32 %v324_v17, %v325_v16 }
 0x176   : > { %v328_v19 = vadd.f32 1e-05, %v326_v18 }
 0x178   : > { %523 = vrsqrt.f32 %v328_v19 }
 0x185   : > { %v524_v21 = vpop.eup %523 }
 0x186   : > { %v330_v22 = vmul.f32 %v524_v21, %v327_v20 }
 0x188   : > { %336 = vperm.xlu1 %521, %v330_v22   ;;  %v332_v24 = vmul.f32 %v330_v22, %v319_v14 }
 0x18a   : > { %v333_v25 = vsub.f32 %v331_v23, %v332_v24 }
 0x18c   : > { %342 = vperm.xlu1 %521, %v333_v25  }
 0x203   : > { %v337_v26 = vpop.permute.xlu1 %336 }
 0x204   : > { %v339_v27 = vmul.f32 %v337_v26, %v310_v7 }
 0x207   : > { %v343_v28 = vpop.permute.xlu1 %342 }
 0x208   : > { %v345_v29 = vadd.f32 %v343_v28, %v339_v27 }
 0x20a   : > { %v346_v30 = vmax.f32 %v345_v29, 0.0 }
 0x20c   : > { %347 = vst.msk [vmem:[%s216_s27] sm:$0xff] %vm314_vm3, %v346_v30 }
 0x20d   : > { %538 = shalt.err (!%p535_p3)
}
 0x20e   : > { %s539_s10 = scalar_lea.hbm %s360_s5, 128  ;;  %s543_s13 = scalar_lea.hbm %s723_s4, 256 }
 0x20f   : > { %p540_p4 = scmp.ne.s32.totalorder %s360_s5, %s539_s10  ;;  %p544_p9 = scmp.lt.s32.totalorder %s360_s5, %s723_s4 }
 0x210   : > { %p545_p10 = scmp.lt.s32.totalorder %s543_s13, %s539_s10 }
 0x211   : > { %p541_p7 = pnand %p540_p4, %p654_p5 }
 0x212   : > { %p546_p11 = por %p545_p10, %p544_p9 }
 0x213   : > { %p542_p8 = pneg %p541_p7 }
 0x215   : > { %p547_p12 = pnand %p546_p11, %p542_p8 }
 0x217   : > { %550 = shalt.err (!%p547_p12)
}
 0x218   : > { %479 = dma.vmem_to_hbm [thread:$0]  (%p654_p5), %s363_s28, 128, %s360_s5, %s349_s6  }
 0x219 PF: > { %p485_p13 = scmp.ge.s32.totalorder %s585_s18, 2  ;;  %s374_s22 = sand.u32 1, %s573_s15  }
 0x21a   : > { %s375_s23 = scalar_lea.sflag [#allocation3], %s374_s22 }
 0x21b   : > { %p482_p0 = pnand %p485_p13, %p658_p6 }
 0x21d   : > { %p483_p1 = pneg %p482_p0 }
 0x21f   : > { %568 = dma.done.wait (%p483_p1), %s375_s23, 128  }
 0x220   : > { %570 = vsyncadd (%p483_p1), %s375_s23, 4294967168  ;;  %p14_p2 = scmp.ge.s32.totalorder %s641_s21, 4   ;;  %s726_s15 = smov %s577_s16 }
 0x221   : > { %s727_s16 = smov %s581_s17  ;;  %s728_s17 = smov %s652_s24 }
 0x222   : > { %s729_s18 = smov %s641_s21  ;;  %16 = sbr.rel (!%p14_p2) target bundleno = 3 (0x3), region = 77 }
 0x227   :  { %380 = vsyncpa [#allocation3], 1 }
 0x228   :  { %382 = vsyncpa [#allocation3 + $0x1], 1 }

</bundles_post_ra>
